<compile_context>
chip_gen: v5e
topology: v5e:2x2
jax: 0.10.0
libtpu: 0.0.40
codegen_flags: <defaults>
</compile_context>

<pallas_src>
import jax
import jax.numpy as jnp
from jax.experimental import pallas as pl
from jax.experimental.pallas import tpu as pltpu

_LANE = 128
_SUBLANE = 8
_TILE_BYTES_BUDGET = 2 * 1024 * 1024  # per tile per buffer


def _copy3_kernel(x_ref, y_ref, z_ref, ox_ref, oy_ref, oz_ref):
    ox_ref[...] = x_ref[...]
    oy_ref[...] = y_ref[...]
    oz_ref[...] = z_ref[...]


def _choose_slab(total: int):
    """Pick a lane-dense (rows, cols) factorization, widest cols first."""
    for cols in (2048, 1024, 512, 256, _LANE):
        if total % cols == 0:
            return total // cols, cols
    # Rare odd-size fallback: a single full-array block (full dims are always
    # legal block dims, even if not multiples of (8, 128)).
    # TODO(synk): pad-to-lane-and-trim would give unmasked stores for odd sizes.
    return 1, total


def _choose_tile_rows(rows: int, cols: int, itemsize: int) -> int:
    """Tile rows so (3 in + 3 out) double-buffered tiles stay well under VMEM."""
    if rows <= _SUBLANE:
        return rows  # full extent along rows -> always a legal block shape
    max_rows = max(_SUBLANE, _TILE_BYTES_BUDGET // (cols * itemsize))
    if max_rows >= rows:
        return rows
    return max(_SUBLANE, (max_rows // _SUBLANE) * _SUBLANE)  # keep multiple of 8


def _forward(x, y, z):
    total = x.size
    assert y.size == total and z.size == total, "reshape_as needs equal element counts"

    rows, cols = _choose_slab(total)
    itemsize = max(jnp.dtype(a.dtype).itemsize for a in (x, y, z))
    tile_rows = _choose_tile_rows(rows, cols, itemsize)
    grid = (pl.cdiv(rows, tile_rows),)

    xf = x.reshape(rows, cols)
    yf = y.reshape(rows, cols)
    zf = z.reshape(rows, cols)

    spec = pl.BlockSpec((tile_rows, cols), lambda i: (i, 0))

    ox, oy, oz = pl.pallas_call(
        _copy3_kernel,
        out_shape=(
            jax.ShapeDtypeStruct((rows, cols), x.dtype),
            jax.ShapeDtypeStruct((rows, cols), y.dtype),
            jax.ShapeDtypeStruct((rows, cols), z.dtype),
        ),
        grid=grid,
        in_specs=[spec, spec, spec],
        out_specs=(spec, spec, spec),
        compiler_params=pltpu.CompilerParams(
            dimension_semantics=("parallel",),
            vmem_limit_bytes=64 * 1024 * 1024,
        ),
    )(xf, yf, zf)

    x_new = ox.reshape(y.shape)        # x.reshape_as(y)
    y_new = oy.reshape(z.shape)        # y.reshape_as(z)
    z_new = oz.reshape(x_new.shape)    # z.reshape_as(x)  (x already reshaped)
    return x_new, y_new, z_new


forward = jax.jit(_forward)


if __name__ == "__main__":
    key = jax.random.PRNGKey(0)
    kx, ky, kz = jax.random.split(key, 3)

    # All three tensors hold the same number of elements (2*4*16*16 = 2048)
    # but have different ranks/shapes, matching the spirit of the pnnx test.
    x = jax.random.normal(kx, (2, 4, 16, 16), dtype=jnp.float32)
    y = jax.random.normal(ky, (2, 64, 16), dtype=jnp.float32)
    z = jax.random.normal(kz, (8, 256), dtype=jnp.float32)

    out_x, out_y, out_z = forward(x, y, z)
    jax.block_until_ready((out_x, out_y, out_z))

    # Reference semantics check (pure JAX reshapes)
    ref_x = x.reshape(y.shape)
    ref_y = y.reshape(z.shape)
    ref_z = z.reshape(ref_x.shape)

    assert out_x.shape == ref_x.shape and out_x.dtype == ref_x.dtype
    assert out_y.shape == ref_y.shape and out_y.dtype == ref_y.dtype
    assert out_z.shape == ref_z.shape and out_z.dtype == ref_z.dtype
    assert jnp.array_equal(out_x, ref_x)
    assert jnp.array_equal(out_y, ref_y)
    assert jnp.array_equal(out_z, ref_z)

    print("KERNEL_OK")
</pallas_src>

<mosaic_0001>
module attributes {stable_mosaic.version = 11 : i64} {
  func.func @_copy3_kernel(%arg0: i32, %arg1: memref<1x2048xf32, #tpu.memory_space<vmem>>, %arg2: memref<1x2048xf32, #tpu.memory_space<vmem>>, %arg3: memref<1x2048xf32, #tpu.memory_space<vmem>>, %arg4: memref<1x2048xf32, #tpu.memory_space<vmem>>, %arg5: memref<1x2048xf32, #tpu.memory_space<vmem>>, %arg6: memref<1x2048xf32, #tpu.memory_space<vmem>>) attributes {dimension_semantics = [#tpu.dimension_semantics<parallel>], iteration_bounds = array<i64: 1>, scalar_prefetch = 0 : i64, scratch_operands = 0 : i64, tpu.core_type = #tpu.core_type<tc>, window_params = [{transform_indices = @transform_0, window_bounds = array<i64: 1, 2048>}, {transform_indices = @transform_1, window_bounds = array<i64: 1, 2048>}, {transform_indices = @transform_2, window_bounds = array<i64: 1, 2048>}, {transform_indices = @transform_3, window_bounds = array<i64: 1, 2048>}, {transform_indices = @transform_4, window_bounds = array<i64: 1, 2048>}, {transform_indices = @transform_5, window_bounds = array<i64: 1, 2048>}]} {
    %c0 = arith.constant 0 : index
    %c0_0 = arith.constant 0 : index
    %0 = vector.load %arg1[%c0, %c0_0] : memref<1x2048xf32, #tpu.memory_space<vmem>>, vector<1x2048xf32>
    %c0_1 = arith.constant 0 : index
    %c0_2 = arith.constant 0 : index
    %1 = vector.load %arg4[%c0_1, %c0_2] : memref<1x2048xf32, #tpu.memory_space<vmem>>, vector<1x2048xf32>
    tpu.vector_store %arg4[%c0_1, %c0_2], %0 {strides = array<i32>} : memref<1x2048xf32, #tpu.memory_space<vmem>>, vector<1x2048xf32>,
    %c0_3 = arith.constant 0 : index
    %c0_4 = arith.constant 0 : index
    %2 = vector.load %arg2[%c0_3, %c0_4] : memref<1x2048xf32, #tpu.memory_space<vmem>>, vector<1x2048xf32>
    %c0_5 = arith.constant 0 : index
    %c0_6 = arith.constant 0 : index
    %3 = vector.load %arg5[%c0_5, %c0_6] : memref<1x2048xf32, #tpu.memory_space<vmem>>, vector<1x2048xf32>
    tpu.vector_store %arg5[%c0_5, %c0_6], %2 {strides = array<i32>} : memref<1x2048xf32, #tpu.memory_space<vmem>>, vector<1x2048xf32>,
    %c0_7 = arith.constant 0 : index
    %c0_8 = arith.constant 0 : index
    %4 = vector.load %arg3[%c0_7, %c0_8] : memref<1x2048xf32, #tpu.memory_space<vmem>>, vector<1x2048xf32>
    %c0_9 = arith.constant 0 : index
    %c0_10 = arith.constant 0 : index
    %5 = vector.load %arg6[%c0_9, %c0_10] : memref<1x2048xf32, #tpu.memory_space<vmem>>, vector<1x2048xf32>
    tpu.vector_store %arg6[%c0_9, %c0_10], %4 {strides = array<i32>} : memref<1x2048xf32, #tpu.memory_space<vmem>>, vector<1x2048xf32>,
    return
  }
  func.func @transform_0(%arg0: i32) -> (i32, i32) {
    %c0_i32 = arith.constant 0 : i32
    %c0_i32_0 = arith.constant 0 : i32
    return %arg0, %c0_i32 : i32, i32
  }
  func.func @transform_1(%arg0: i32) -> (i32, i32) {
    %c0_i32 = arith.constant 0 : i32
    %c0_i32_0 = arith.constant 0 : i32
    return %arg0, %c0_i32 : i32, i32
  }
  func.func @transform_2(%arg0: i32) -> (i32, i32) {
    %c0_i32 = arith.constant 0 : i32
    %c0_i32_0 = arith.constant 0 : i32
    return %arg0, %c0_i32 : i32, i32
  }
  func.func @transform_3(%arg0: i32) -> (i32, i32) {
    %c0_i32 = arith.constant 0 : i32
    %c0_i32_0 = arith.constant 0 : i32
    return %arg0, %c0_i32 : i32, i32
  }
  func.func @transform_4(%arg0: i32) -> (i32, i32) {
    %c0_i32 = arith.constant 0 : i32
    %c0_i32_0 = arith.constant 0 : i32
    return %arg0, %c0_i32 : i32, i32
  }
  func.func @transform_5(%arg0: i32) -> (i32, i32) {
    %c0_i32 = arith.constant 0 : i32
    %c0_i32_0 = arith.constant 0 : i32
    return %arg0, %c0_i32 : i32, i32
  }
}

</mosaic_0001>

<bundles_post_ra>
// kernel: _forward.1
= control target key start
LH: loop header
LB: loop body
LE: loop exit
PB: predicated region body
PF: predicated region fallthrough
CT: control target
= control target key end

     0   :  { %s107_s0 = inlined_call_operand.vmem [shape: f32[1,2048], index: 0, kind: input, shape index: {}]   ;;  %s108_s3 = inlined_call_operand.vmem [shape: f32[1,2048], index: 3, kind: output, shape index: {0}]   ;;  %s109_s1 = inlined_call_operand.vmem [shape: f32[1,2048], index: 1, kind: input, shape index: {}]   ;;  %s110_s2 = inlined_call_operand.vmem [shape: f32[1,2048], index: 2, kind: input, shape index: {}]   ;;  %s111_s4 = inlined_call_operand.vmem [shape: f32[1,2048], index: 4, kind: output, shape index: {1}]   ;;  %s112_s5 = inlined_call_operand.vmem [shape: f32[1,2048], index: 5, kind: output, shape index: {2}]  }
   0x1   :  { %v17_v0 = vld [vmem:[%s107_s0] sm:$0xff]  ;;  %v18_v1 = vld [vmem:[%s107_s0 + $0x8] sm:$0xff] }
   0x2   :  { %v21_v2 = vld [vmem:[%s109_s1] sm:$0xff]  ;;  %19 = vst [vmem:[%s108_s3] sm:$0xff] %v17_v0  ;;  %v22_v3 = vld [vmem:[%s109_s1 + $0x8] sm:$0xff] }
   0x3   :  { %20 = vst [vmem:[%s108_s3 + $0x8] sm:$0xff] %v18_v1  ;;  %v25_v4 = vld [vmem:[%s110_s2] sm:$0xff]  ;;  %v26_v5 = vld [vmem:[%s110_s2 + $0x8] sm:$0xff] }
   0x4   :  { %23 = vst [vmem:[%s111_s4] sm:$0xff] %v21_v2 }
   0x5   :  { %24 = vst [vmem:[%s111_s4 + $0x8] sm:$0xff] %v22_v3 }
   0x6   :  { %27 = vst [vmem:[%s112_s5] sm:$0xff] %v25_v4 }
   0x7   :  { %28 = vst [vmem:[%s112_s5 + $0x8] sm:$0xff] %v26_v5 }

</bundles_post_ra>
